<compile_context>
chip_gen: v7x
topology: tpu7x:2x2x1
jax: 0.10.0
libtpu: 0.0.40
codegen_flags: <defaults>
</compile_context>

<pallas_src>
import math

import jax
import jax.numpy as jnp
from jax.experimental import pallas as pl
from jax.experimental.pallas import tpu as pltpu


def _linear_relu_kernel(x_ref, w_ref, b_ref, o_ref):
    # x_ref: (B, F) in its original dtype; cast in-kernel (free on VPU slack).
    x = x_ref[...].astype(jnp.float32)                  # (B, F)
    w = w_ref[...]                                      # (F, O) f32, K-first
    b = b_ref[...]                                      # (1, O) f32

    # Canonical lhs-last / rhs-first contraction -> direct MXU weight push.
    y = jnp.dot(x, w, preferred_element_type=jnp.float32)   # (B, O)
    o_ref[...] = jnp.maximum(y + b, 0.0)


def prepare_params(weight, bias):
    """One-time layout prep (NOT per forward call).

    weight: (O, F) PyTorch layout -> (F, O) K-first for the MXU.
    bias:   (O,)                  -> (1, O) row for broadcast add.
    """
    w_t = jnp.asarray(weight, dtype=jnp.float32).T          # (F, O)
    b_row = jnp.asarray(bias, dtype=jnp.float32).reshape(1, -1)
    return w_t, b_row


def network_forward(state, w_t, b_row):
    """state: (B, 1, F) any float dtype; w_t: (F, O); b_row: (1, O) -> (B, O) f32."""
    B, _, F = state.shape
    O = w_t.shape[1]

    # torch.squeeze(state, 1): metadata-only reshape of the unit time dim.
    x2d = state.reshape(B, F)

    vmem_spec = pl.BlockSpec(memory_space=pltpu.MemorySpace.VMEM)
    return pl.pallas_call(
        _linear_relu_kernel,
        out_shape=jax.ShapeDtypeStruct((B, O), jnp.float32),
        in_specs=[vmem_spec, vmem_spec, vmem_spec],
        out_specs=vmem_spec,
    )(x2d, w_t, b_row)


def init_params(key, n_input, n_output):
    """Deterministic init mirroring the PyTorch module's __init__ (native layout)."""
    k_w, k_b = jax.random.split(key)
    # xavier_uniform_ with gain = calculate_gain('relu') = sqrt(2)
    gain = math.sqrt(2.0)
    bound_w = gain * math.sqrt(6.0 / (n_input + n_output))
    weight = jax.random.uniform(
        k_w, (n_output, n_input), jnp.float32, minval=-bound_w, maxval=bound_w
    )
    # nn.Linear default bias init: U(-1/sqrt(fan_in), 1/sqrt(fan_in))
    bound_b = 1.0 / math.sqrt(n_input)
    bias = jax.random.uniform(
        k_b, (n_output,), jnp.float32, minval=-bound_b, maxval=bound_b
    )
    return weight, bias


if __name__ == "__main__":
    key = jax.random.PRNGKey(0)
    k_param, k_state = jax.random.split(key)

    B, F, O = 8, 32, 16                      # small shapes: batch, n_input, n_output
    weight, bias = init_params(k_param, F, O)

    # One-time parameter layout prep (outside the per-call path).
    w_t, b_row = prepare_params(weight, bias)

    state = jax.random.normal(k_state, (B, 1, F), dtype=jnp.float32)

    out = network_forward(state, w_t, b_row)
    out = jax.block_until_ready(out)

    # Sanity check against plain-JAX reference (matches the PyTorch forward).
    ref = jnp.maximum(jnp.squeeze(state, 1).astype(jnp.float32) @ weight.T + bias, 0.0)
    assert out.shape == (B, O)
    assert jnp.allclose(out, ref, atol=1e-5, rtol=1e-5)

    print("KERNEL_OK")
</pallas_src>

<mosaic_0001>
module attributes {stable_mosaic.version = 11 : i64} {
  func.func @_linear_relu_kernel(%arg0: memref<8x32xf32, #tpu.memory_space<vmem>>, %arg1: memref<32x16xf32, #tpu.memory_space<vmem>>, %arg2: memref<1x16xf32, #tpu.memory_space<vmem>>, %arg3: memref<8x16xf32, #tpu.memory_space<vmem>>) attributes {dimension_semantics = [], scalar_prefetch = 0 : i64, scratch_operands = 0 : i64, tpu.core_type = #tpu.core_type<tc>} {
    %c0 = arith.constant 0 : index
    %c0_0 = arith.constant 0 : index
    %0 = vector.load %arg0[%c0, %c0_0] : memref<8x32xf32, #tpu.memory_space<vmem>>, vector<8x32xf32>
    %c0_1 = arith.constant 0 : index
    %c0_2 = arith.constant 0 : index
    %1 = vector.load %arg1[%c0_1, %c0_2] : memref<32x16xf32, #tpu.memory_space<vmem>>, vector<32x16xf32>
    %c0_3 = arith.constant 0 : index
    %c0_4 = arith.constant 0 : index
    %2 = vector.load %arg2[%c0_3, %c0_4] : memref<1x16xf32, #tpu.memory_space<vmem>>, vector<1x16xf32>
    %cst = arith.constant dense<0.000000e+00> : vector<8x16xf32>
    %3 = tpu.matmul %0, %1, %cst {dimension_numbers = #tpu.dot_dimension_numbers<[1], [0], [0], [1], [0, 0, 1, 1], [], []>} : vector<8x32xf32>, vector<32x16xf32>, vector<8x16xf32> -> vector<8x16xf32>
    %4 = vector.broadcast %2 : vector<1x16xf32> to vector<8x16xf32>
    %5 = arith.addf %3, %4 : vector<8x16xf32>
    %cst_5 = arith.constant 0.000000e+00 : f32
    %6 = vector.broadcast %cst_5 : f32 to vector<8x16xf32>
    %7 = arith.maximumf %5, %6 : vector<8x16xf32>
    %c0_6 = arith.constant 0 : index
    %c0_7 = arith.constant 0 : index
    %8 = vector.load %arg3[%c0_6, %c0_7] : memref<8x16xf32, #tpu.memory_space<vmem>>, vector<8x16xf32>
    tpu.vector_store %arg3[%c0_6, %c0_7], %7 {strides = array<i32>} : memref<8x16xf32, #tpu.memory_space<vmem>>, vector<8x16xf32>,
    return
  }
}

</mosaic_0001>

<bundles_post_ra>
// kernel: tpu_custom_call.1
= control target key start
LH: loop header
LB: loop body
LE: loop exit
PB: predicated region body
PF: predicated region fallthrough
CT: control target
= control target key end

     0   :  { %v170_v3 = vmov 0.0|0.0   ;;  %vm171_vm0 = vmmov 0   ;;  %v172_v6 = vmov 0.0   ;;  %s224_s0 = inlined_call_operand.vmem [shape: f32[8,32], index: 0, kind: input, shape index: {}]   ;;  %s225_s1 = inlined_call_operand.vmem [shape: f32[32,16], index: 1, kind: input, shape index: {}]   ;;  %s226_s2 = inlined_call_operand.vmem [shape: f32[1,16], index: 2, kind: input, shape index: {}]   ;;  %s227_s3 = inlined_call_operand.hbm [shape: f32[8,16], index: 3, kind: output, shape index: {}]  }
   0x1   :  { %v16_v0 = vld [vmem:[%s225_s1] sm:$0xff]  ;;  %v17_v1 = vld [vmem:[%s225_s1 + $0x8] sm:$0xff]  ;;  %v18_v2 = vld [vmem:[%s225_s1 + $0x10] sm:$0xff]  ;;  %136 = vmatprep.subr.bf16.mxu0 %v170_v3  ;;  %133 = vmatprep.mubr.msk.f32.mxu0 %vm171_vm0, %v172_v6 }
   0x2   :  { %v137_v4 = vpack.c.bf16 %v17_v1, %v16_v0  ;;  %v19_v5 = vld [vmem:[%s225_s1 + $0x18] sm:$0xff] }
   0x3   :  { %8 = vsyncpa [#allocation3], 0  ;;  %v140_v7 = vpack.c.bf16 %v19_v5, %v18_v2  ;;  %v15_v8 = vld [vmem:[%s224_s0] sm:$0xff]  ;;  %vm27_vm1 = vcmask 261120   ;;  %s173_s1 = smov [#allocation2]   ;;  %vm102_vm2 = vcmask 130048  }
   0x4   :  { %138 = vmatpush3.bf16.msra.mxu0 %v137_v4  ;;  %v118_v9 = vld [vmem:[%s226_s2] ss:$0 sm:$0xff]  ;;  %s110_s24 = sshll.u32 %s173_s1, 4  ;;  %s111_s24 = int_to_ptr.vmem [resolvable:$true] %s110_s24 }
   0x5   :  { %139 = vmatprep.subr.bf16.mxu0 %v170_v3  ;;  %s146_s25 = scalar_lea.vmem %s111_s24, 128  ;;  %p151_p1 = scmp.lt.s32.totalorder %s111_s24, %s111_s24 }
   0x6   :  { %p147_p0 = scmp.ne.s32.totalorder %s111_s24, %s146_s25  ;;  %p152_p2 = scmp.lt.s32.totalorder %s146_s25, %s146_s25 }
   0x8   :  { %141 = vmatpush3.bf16.msra.mxu0 %v140_v7  ;;  %p153_p3 = por %p152_p2, %p151_p1 }
   0xa   :  { %p154_p4 = pnand %p153_p3, %p147_p0 }
   0xb   :  { %134 = vmatmul.mubr.msk.f32.vlgmr.msra.gmra.mrb[0].mxu0 %vm27_vm1, %v15_v8 }
  0xde   :  { %v97_v10 = vpop.f32.mrb[0].mxu0 }
  0xdf   :  { %v98_v11 = vadd.f32 %v118_v9, %v97_v10  ;;  %v135_v12 = vpop.f32.mrb[1].mxu0 }
  0xe1   :  { %v101_v13 = vmax.f32 %v98_v11, 0.0 }
  0xe3   :  { %103 = vst.msk [vmem:[#allocation2] sm:$0xff] %vm102_vm2, %v101_v13 }
  0xe4   :  { %157 = shalt.err (!%p154_p4)
}
  0xe5   :  { %s158_s2 = scalar_lea.hbm %s227_s3, 128 }
  0xe6   :  { %p159_p5 = scmp.ne.s32.totalorder %s227_s3, %s158_s2  ;;  %p162_p6 = scmp.lt.u32.totalorder %s158_s2, %s227_s3 }
  0xe8   :  { %p164_p7 = pnand %p162_p6, %p159_p5 }
  0xea   :  { %167 = shalt.err (!%p164_p7)
}
  0xeb   :  { %113 = dma.vmem_to_hbm [thread:$0]  %s111_s24, 128, %s227_s3, [#allocation3]  }
  0xec   :  { %168 = dma.done.wait [#allocation3], 128  }
  0xed   :  { %169 = vsyncadd [#allocation3], 4294967168 }
  0xee   :  { %117 = vsyncpa [#allocation3], 1 }

</bundles_post_ra>
